<compile_context>
chip_gen: v5e
topology: v5e:2x2
jax: 0.10.0
libtpu: 0.0.40
codegen_flags: <defaults>
</compile_context>

<pallas_src>
import jax
import jax.numpy as jnp
from jax.experimental import pallas as pl
from jax.experimental.pallas import tpu as pltpu


# ----------------------------------------------------------------------------
# Kernels
# ----------------------------------------------------------------------------
def _expert_kernel_acc(x_ref, w13_ref, w2_ref, o_ref, acc_ref):
    # grid = (token_tiles, hidden_tiles); hidden is a reduction axis ("arbitrary").
    # x_ref:   (tm, dim)      current token tile
    # w13_ref: (dim, 2*th)    fused [w1_tile | w3_tile] for this hidden tile
    # w2_ref:  (th, dim)      w2 tile for this hidden tile
    # o_ref:   (tm, dim)      output tile (resident across the hidden axis)
    # acc_ref: (tm, dim) f32  VMEM accumulator scratch
    h = pl.program_id(1)

    @pl.when(h == 0)
    def _():
        acc_ref[...] = jnp.zeros_like(acc_ref)

    th = w2_ref.shape[0]
    h13 = jnp.dot(x_ref[...], w13_ref[...], preferred_element_type=jnp.float32)
    h1 = h13[:, :th]
    h3 = h13[:, th:]
    gate = (h1 * jax.nn.sigmoid(h1)) * h3  # SwiGLU gate in f32 (sigmoid -> EUP)

    acc_ref[...] += jnp.dot(gate.astype(w2_ref.dtype), w2_ref[...],
                            preferred_element_type=jnp.float32)

    @pl.when(h == pl.num_programs(1) - 1)
    def _():
        o_ref[...] = acc_ref[...].astype(o_ref.dtype)


def _expert_kernel_single(x_ref, w13_ref, w2_ref, o_ref):
    # grid = (token_tiles,): whole hidden dim in one tile -> no accumulator RMW.
    th = w2_ref.shape[0]
    h13 = jnp.dot(x_ref[...], w13_ref[...], preferred_element_type=jnp.float32)
    h1 = h13[:, :th]
    h3 = h13[:, th:]
    gate = (h1 * jax.nn.sigmoid(h1)) * h3
    o_ref[...] = jnp.dot(gate.astype(w2_ref.dtype), w2_ref[...],
                         preferred_element_type=jnp.float32).astype(o_ref.dtype)


# ----------------------------------------------------------------------------
# Generation-aware tiling / VMEM budgeting
# ----------------------------------------------------------------------------
def _round_up(x, m):
    return (x + m - 1) // m * m


def _tpu_params():
    vmem_cap = 128 << 20
    try:
        vmem_cap = int(pltpu.get_tpu_info().vmem_capacity_bytes)
    except Exception:
        pass
    kind = ""
    try:
        kind = jax.devices()[0].device_kind.lower()
    except Exception:
        pass
    small_vmem = vmem_cap <= (64 << 20)                 # v7x-style: 64 MiB / TC
    quant = 128 if ("v5 lite" in kind or "v5e" in kind) else 256
    cores = 2 if (small_vmem or "v7" in kind) else 1    # TCs sharing the grid
    if small_vmem:
        budget, clamp = 40 << 20, 56 << 20
    else:
        budget, clamp = 96 << 20, 104 << 20
    return {"vmem_cap": vmem_cap, "budget": budget, "clamp": clamp,
            "quant": quant, "cores": cores}


def _footprint_bytes(tm, th, dim, n_hid, c_item, o_item):
    x_b = 2 * tm * dim * c_item              # double-buffered x tile
    w13_b = 2 * dim * 2 * th * c_item        # double-buffered [w1|w3] tile
    w2_b = 2 * th * dim * c_item             # double-buffered w2 tile
    o_b = 2 * tm * dim * o_item              # double-buffered output tile
    acc_b = tm * dim * 4 if n_hid > 1 else 0 # f32 accumulator scratch
    tmp_b = tm * 3 * th * 4                  # f32 h13 + gate temporaries
    return x_b + w13_b + w2_b + o_b + acc_b + tmp_b


def _pick_th(hidden, dim, c_item, params):
    cands = [t for t in range(128, hidden + 1, 128) if hidden % t == 0]
    if not cands:
        return hidden
    preferred = 256 if params["vmem_cap"] <= (64 << 20) else 512
    desc = sorted([t for t in cands if t <= preferred], reverse=True) or [min(cands)]
    probe_tm = params["quant"]  # a token tile this small must stay viable
    for t in desc:
        if _footprint_bytes(probe_tm, t, dim, hidden // t, c_item, c_item) <= params["budget"]:
            return t
    return min(cands)


def _pick_tm(tokens, dim, th, n_hid, c_item, o_item, budget, quant, cores, cap=1024):
    min_align = 16 if c_item < 4 else 8
    if tokens <= quant:
        return max(min_align, _round_up(tokens, min_align))
    max_tm = min(_round_up(tokens, quant), cap)
    if cores > 1:
        # keep >= `cores` token tiles so the "parallel" grid axis feeds every TC
        per_core = max(quant, (_round_up(tokens, quant) // cores) // quant * quant)
        max_tm = min(max_tm, per_core)
    tm = quant
    t = quant
    while t <= max_tm:
        if _footprint_bytes(t, th, dim, n_hid, c_item, o_item) <= budget:
            tm = t
        t += quant
    return tm


def _fuse_w13(w1_t, w3_t, th):
    """Interleave w1^T / w3^T so each hidden tile is a contiguous [w1|w3] block."""
    dim, hidden = w1_t.shape
    nh = hidden // th
    w1r = w1_t.reshape(dim, nh, th)
    w3r = w3_t.reshape(dim, nh, th)
    return jnp.concatenate([w1r, w3r], axis=2).reshape(dim, nh * 2 * th)


# ----------------------------------------------------------------------------
# Weight prep (call once at weight-load time; cache the result)
# ----------------------------------------------------------------------------
def prepare_expert_weights(w1_t, w3_t, w2_t, *, compute_dtype=None, th=None):
    """w1_t/w3_t: (dim, hidden) = torch w1.weight.T / w3.weight.T; w2_t: (hidden, dim)."""
    dim, hidden = w1_t.shape
    assert w3_t.shape == (dim, hidden) and w2_t.shape == (hidden, dim)
    params = _tpu_params()
    if compute_dtype is None:
        # bf16 MXU operands (f32 matmul is a multi-pass path on v5e/v6e and
        # doubles weight HBM bytes); f32 accumulation stays inside the kernel.
        compute_dtype = jnp.bfloat16 if w1_t.dtype == jnp.float32 else w1_t.dtype
    c_item = jnp.dtype(compute_dtype).itemsize
    if th is None:
        th = _pick_th(hidden, dim, c_item, params)
    assert hidden % th == 0
    w13 = _fuse_w13(w1_t.astype(compute_dtype), w3_t.astype(compute_dtype), th)
    return {"w13": w13, "w2": w2_t.astype(compute_dtype), "th": int(th),
            "dim": int(dim), "hidden": int(hidden),
            "compute_dtype": jnp.dtype(compute_dtype), "tpu": params}


# ----------------------------------------------------------------------------
# Forward wrapper
# ----------------------------------------------------------------------------
def expert_forward(x, prepared, *, tm=None):
    """x: (..., dim); `prepared` is the dict from prepare_expert_weights()."""
    w13, w2_t = prepared["w13"], prepared["w2"]
    th, dim, hidden = prepared["th"], prepared["dim"], prepared["hidden"]
    cd, params = prepared["compute_dtype"], prepared["tpu"]

    lead = x.shape[:-1]
    assert x.shape[-1] == dim
    out_dtype = x.dtype
    xf = x.reshape(-1, dim)
    tokens = xf.shape[0]

    c_item = jnp.dtype(cd).itemsize
    o_item = jnp.dtype(out_dtype).itemsize
    n_hid = hidden // th

    if tm is None:
        tm = _pick_tm(tokens, dim, th, n_hid, c_item, o_item,
                      params["budget"], params["quant"], params["cores"])
    padded = _round_up(tokens, tm)
    n_tok = padded // tm

    xc = xf.astype(cd)
    if padded != tokens:
        xc = jnp.pad(xc, ((0, padded - tokens), (0, 0)))

    fp = _footprint_bytes(tm, th, dim, n_hid, c_item, o_item)
    vmem_limit = int(min(max(fp + (8 << 20), 32 << 20), params["clamp"]))

    w_bytes = (dim * 2 * hidden + hidden * dim) * c_item
    cost = pl.CostEstimate(
        flops=6 * padded * dim * hidden + 4 * padded * hidden,
        transcendentals=padded * hidden,
        bytes_accessed=padded * dim * (c_item + o_item) + n_tok * w_bytes,
    )

    if n_hid == 1:
        grid_spec = pltpu.PrefetchScalarGridSpec(
            num_scalar_prefetch=0,
            grid=(n_tok,),
            in_specs=[
                pl.BlockSpec((tm, dim), lambda i: (i, 0)),        # x tile
                pl.BlockSpec((dim, 2 * th), lambda i: (0, 0)),    # full [w1|w3]
                pl.BlockSpec((th, dim), lambda i: (0, 0)),        # full w2
            ],
            out_specs=pl.BlockSpec((tm, dim), lambda i: (i, 0)),
        )
        kernel = _expert_kernel_single
        dim_sem = ("parallel",)
    else:
        def _serp(i, h):
            # serpentine hidden sweep: odd token tiles walk the hidden axis in
            # reverse so the last weight tile of tile i is reused for tile i+1.
            return h + (i % 2) * (n_hid - 1 - 2 * h)

        grid_spec = pltpu.PrefetchScalarGridSpec(
            num_scalar_prefetch=0,
            grid=(n_tok, n_hid),
            in_specs=[
                pl.BlockSpec((tm, dim), lambda i, h: (i, 0)),                # x tile
                pl.BlockSpec((dim, 2 * th), lambda i, h: (0, _serp(i, h))),  # [w1|w3] tile
                pl.BlockSpec((th, dim), lambda i, h: (_serp(i, h), 0)),      # w2 tile
            ],
            out_specs=pl.BlockSpec((tm, dim), lambda i, h: (i, 0)),
            scratch_shapes=[pltpu.VMEM((tm, dim), jnp.float32)],
        )
        kernel = _expert_kernel_acc
        dim_sem = ("parallel", "arbitrary")

    out = pl.pallas_call(
        kernel,
        out_shape=jax.ShapeDtypeStruct((padded, dim), out_dtype),
        grid_spec=grid_spec,
        compiler_params=pltpu.CompilerParams(
            dimension_semantics=dim_sem,
            vmem_limit_bytes=vmem_limit,
        ),
        cost_estimate=cost,
    )(xc, w13, w2_t)

    if padded != tokens:
        out = out[:tokens]
    # TODO(synk): training-mode dropout (stateful PRNG masking) not implemented;
    # nn.Dropout is identity in eval mode, which this forward matches.
    return out.reshape(*lead, dim)


def expert_reference(x, w1_t, w3_t, w2_t):
    h1 = x @ w1_t
    h3 = x @ w3_t
    return (jax.nn.silu(h1) * h3) @ w2_t


# ----------------------------------------------------------------------------
# Demo / self-test
# ----------------------------------------------------------------------------
if __name__ == "__main__":
    key = jax.random.PRNGKey(0)
    k_toy, k_big, k_auto = jax.random.split(key, 3)

    def linear_weight(k, out_f, in_f, dtype=jnp.float32):
        bound = 1.0 / float(in_f) ** 0.5
        return jax.random.uniform(k, (out_f, in_f), jnp.float32, -bound, bound).astype(dtype)

    # ---- Test 1: module-consistent toy shapes, pure f32 path, tight tol ----
    batch, seq, dim, hidden_dim = 2, 8, 32, 64
    kx, k1, k2, k3 = jax.random.split(k_toy, 4)
    x = jax.random.normal(kx, (batch, seq, dim), dtype=jnp.float32)
    w1 = linear_weight(k1, hidden_dim, dim)   # (hidden, dim) like nn.Linear.weight
    w2 = linear_weight(k2, dim, hidden_dim)   # (dim, hidden)
    w3 = linear_weight(k3, hidden_dim, dim)   # (hidden, dim)

    prep_f32 = prepare_expert_weights(w1.T, w3.T, w2.T, compute_dtype=jnp.float32)
    out = expert_forward(x, prep_f32)
    jax.block_until_ready(out)
    ref = expert_reference(x, w1.T, w3.T, w2.T)
    assert out.shape == (batch, seq, dim)
    assert jnp.allclose(out, ref, atol=1e-5, rtol=1e-5), "toy f32 mismatch vs reference"

    # ---- Test 2: bf16, ragged tokens (padding) + forced hidden tiling ------
    tokens2, dim2, hidden2 = 200, 128, 256
    kx2, k12, k22, k32 = jax.random.split(k_big, 4)
    x2 = jax.random.normal(kx2, (tokens2, dim2), jnp.float32).astype(jnp.bfloat16)
    w1b = linear_weight(k12, hidden2, dim2, jnp.bfloat16)
    w2b = linear_weight(k22, dim2, hidden2, jnp.bfloat16)
    w3b = linear_weight(k32, hidden2, dim2, jnp.bfloat16)

    prep_bf16 = prepare_expert_weights(w1b.T, w3b.T, w2b.T, th=128)  # 2 hidden tiles
    out2 = expert_forward(x2, prep_bf16)
    jax.block_until_ready(out2)
    ref2 = expert_reference(x2.astype(jnp.float32), w1b.T.astype(jnp.float32),
                            w3b.T.astype(jnp.float32), w2b.T.astype(jnp.float32))
    assert out2.shape == (tokens2, dim2)
    err2 = float(jnp.max(jnp.abs(out2.astype(jnp.float32) - ref2)))
    assert err2 < 5e-2, f"bf16 tiled/padded mismatch vs reference (max abs err {err2})"

    # ---- Test 3: f32 inputs, default prep (auto bf16 MXU operands) ---------
    tokens3, dim3, hidden3 = 256, 128, 256
    kx3, k13, k23, k33 = jax.random.split(k_auto, 4)
    x3 = jax.random.normal(kx3, (tokens3, dim3), jnp.float32)
    w1c = linear_weight(k13, hidden3, dim3)
    w2c = linear_weight(k23, dim3, hidden3)
    w3c = linear_weight(k33, hidden3, dim3)

    prep_auto = prepare_expert_weights(w1c.T, w3c.T, w2c.T)  # auto bf16 compute
    out3 = expert_forward(x3, prep_auto)
    jax.block_until_ready(out3)
    ref3 = expert_reference(x3, w1c.T, w3c.T, w2c.T)
    err3 = float(jnp.max(jnp.abs(out3 - ref3)))
    assert err3 < 5e-2, f"auto-bf16 mismatch vs reference (max abs err {err3})"

    print("KERNEL_OK")
</pallas_src>

<mosaic_0001>
module attributes {stable_mosaic.version = 11 : i64} {
  func.func @_expert_kernel_single(%arg0: i32, %arg1: memref<16x32xf32, #tpu.memory_space<vmem>>, %arg2: memref<32x128xf32, #tpu.memory_space<vmem>>, %arg3: memref<64x32xf32, #tpu.memory_space<vmem>>, %arg4: memref<16x32xf32, #tpu.memory_space<vmem>>) attributes {dimension_semantics = [#tpu.dimension_semantics<parallel>], iteration_bounds = array<i64: 1>, scalar_prefetch = 0 : i64, scratch_operands = 0 : i64, tpu.core_type = #tpu.core_type<tc>, window_params = [{transform_indices = @transform_0, window_bounds = array<i64: 16, 32>}, {pipeline_mode = #tpu.pipeline_mode<synchronous>, transform_indices = @transform_1, window_bounds = array<i64: 32, 128>}, {pipeline_mode = #tpu.pipeline_mode<synchronous>, transform_indices = @transform_2, window_bounds = array<i64: 64, 32>}, {transform_indices = @transform_3, window_bounds = array<i64: 16, 32>}]} {
    %c0 = arith.constant 0 : index
    %c0_0 = arith.constant 0 : index
    %0 = vector.load %arg1[%c0, %c0_0] : memref<16x32xf32, #tpu.memory_space<vmem>>, vector<16x32xf32>
    %c0_1 = arith.constant 0 : index
    %c0_2 = arith.constant 0 : index
    %1 = vector.load %arg2[%c0_1, %c0_2] : memref<32x128xf32, #tpu.memory_space<vmem>>, vector<32x128xf32>
    %cst = arith.constant dense<0.000000e+00> : vector<16x128xf32>
    %2 = tpu.matmul %0, %1, %cst {dimension_numbers = #tpu.dot_dimension_numbers<[1], [0], [0], [1], [0, 0, 1, 1], [], []>} : vector<16x32xf32>, vector<32x128xf32>, vector<16x128xf32> -> vector<16x128xf32>
    %3 = vector.extract_strided_slice %2 {offsets = [0, 0], sizes = [16, 64], strides = [1, 1]} : vector<16x128xf32> to vector<16x64xf32>
    %4 = vector.extract_strided_slice %2 {offsets = [0, 64], sizes = [16, 64], strides = [1, 1]} : vector<16x128xf32> to vector<16x64xf32>
    %5 = arith.negf %3 : vector<16x64xf32>
    %6 = math.exp %5 : vector<16x64xf32>
    %cst_3 = arith.constant 1.000000e+00 : f32
    %7 = vector.broadcast %cst_3 : f32 to vector<16x64xf32>
    %8 = arith.addf %7, %6 : vector<16x64xf32>
    %9 = arith.divf %7, %8 : vector<16x64xf32>
    %10 = arith.mulf %3, %9 : vector<16x64xf32>
    %11 = arith.mulf %10, %4 : vector<16x64xf32>
    %c0_4 = arith.constant 0 : index
    %c0_5 = arith.constant 0 : index
    %12 = vector.load %arg3[%c0_4, %c0_5] : memref<64x32xf32, #tpu.memory_space<vmem>>, vector<64x32xf32>
    %cst_6 = arith.constant dense<0.000000e+00> : vector<16x32xf32>
    %13 = tpu.matmul %11, %12, %cst_6 {dimension_numbers = #tpu.dot_dimension_numbers<[1], [0], [0], [1], [0, 0, 1, 1], [], []>} : vector<16x64xf32>, vector<64x32xf32>, vector<16x32xf32> -> vector<16x32xf32>
    %c0_7 = arith.constant 0 : index
    %c0_8 = arith.constant 0 : index
    %14 = vector.load %arg4[%c0_7, %c0_8] : memref<16x32xf32, #tpu.memory_space<vmem>>, vector<16x32xf32>
    tpu.vector_store %arg4[%c0_7, %c0_8], %13 {strides = array<i32>} : memref<16x32xf32, #tpu.memory_space<vmem>>, vector<16x32xf32>,
    return
  }
  func.func @transform_0(%arg0: i32) -> (i32, i32) {
    %c0_i32 = arith.constant 0 : i32
    %c0_i32_0 = arith.constant 0 : i32
    return %arg0, %c0_i32 : i32, i32
  }
  func.func @transform_1(%arg0: i32) -> (i32, i32) {
    %c0_i32 = arith.constant 0 : i32
    %c0_i32_0 = arith.constant 0 : i32
    %c0_i32_1 = arith.constant 0 : i32
    return %c0_i32, %c0_i32_0 : i32, i32
  }
  func.func @transform_2(%arg0: i32) -> (i32, i32) {
    %c0_i32 = arith.constant 0 : i32
    %c0_i32_0 = arith.constant 0 : i32
    %c0_i32_1 = arith.constant 0 : i32
    return %c0_i32, %c0_i32_0 : i32, i32
  }
  func.func @transform_3(%arg0: i32) -> (i32, i32) {
    %c0_i32 = arith.constant 0 : i32
    %c0_i32_0 = arith.constant 0 : i32
    return %arg0, %c0_i32 : i32, i32
  }
}

</mosaic_0001>

<bundles_post_ra>
// kernel: tpu_custom_call.1
= control target key start
LH: loop header
LB: loop body
LE: loop exit
PB: predicated region body
PF: predicated region fallthrough
CT: control target
= control target key end

     0   :  { %s288_s0 = inlined_call_operand.vmem [shape: f32[16,32], index: 0, kind: input, shape index: {}]   ;;  %s289_s1 = inlined_call_operand.vmem [shape: f32[32,128], index: 1, kind: input, shape index: {}]   ;;  %s290_s2 = inlined_call_operand.vmem [shape: f32[64,32], index: 2, kind: input, shape index: {}]   ;;  %s291_s3 = inlined_call_operand.hbm [shape: f32[16,32], index: 3, kind: output, shape index: {}]  }
   0x1   :  { %v20_v0 = vld [vmem:[%s289_s1 + $0x18] sm:$0xff]  ;;  %v19_v1 = vld [vmem:[%s289_s1 + $0x10] sm:$0xff]  ;;  %v18_v2 = vld [vmem:[%s289_s1 + $0x8] sm:$0xff] }
   0x2   :  { %40 = vmatpush.msra.mxu0 %v20_v0  ;;  %165 = vmatpush.msra.mxu3 %v20_v0 }
   0x3   :  { %8 = vsyncpa [#allocation3], 0  ;;  %v17_v3 = vld [vmem:[%s289_s1] sm:$0xff]  ;;  %vm21_vm0 = vcmask 261120   ;;  %v16_v5 = vld [vmem:[%s288_s0 + $0x8] sm:$0xff]  ;;  %vm109_vm8 = vcmask 523264  }
   0x4   :  { %41 = vmatpush.msra.mxu0 %v19_v1  ;;  %166 = vmatpush.msra.mxu3 %v19_v1  ;;  %v15_v4 = vld [vmem:[%s288_s0] sm:$0xff]  ;;  %v108_v6 = vld [vmem:[%s290_s2 + $0x38] sm:$0xff]  ;;  %v107_v7 = vld [vmem:[%s290_s2 + $0x30] sm:$0xff]  ;;  %s215_s0 = smov 64   ;;  %s147_s15 = sshll.u32 %s291_s3, 4  ;;  %s148_s15 = int_to_ptr.hbm [resolvable:$true] %s147_s15 }
   0x5   :  { %169 = vmatpush.msra.mxu2 %v108_v6  ;;  %124 = vmatpush.msra.mxu1 %v108_v6  ;;  %v106_v8 = vld [vmem:[%s290_s2 + $0x28] sm:$0xff]  ;;  %v105_v10 = vld [vmem:[%s290_s2 + $0x20] sm:$0xff]  ;;  %v104_v11 = vld [vmem:[%s290_s2 + $0x18] sm:$0xff]  ;;  %s217_s16 = smov 128   ;;  %s218_s17 = smov 8  }
   0x6   :  { %42 = vmatpush.msra.mxu0 %v18_v2  ;;  %167 = vmatpush.msra.mxu3 %v18_v2  ;;  %v103_v12 = vld [vmem:[%s290_s2 + $0x10] sm:$0xff]  ;;  %v102_v13 = vld [vmem:[%s290_s2 + $0x8] sm:$0xff]  ;;  %v101_v20 = vld [vmem:[%s290_s2] sm:$0xff]  ;;  %s216_s2 = smov [#allocation2]  }
   0x7   :  { %170 = vmatpush.msra.mxu2 %v107_v7  ;;  %125 = vmatpush.msra.mxu1 %v107_v7  ;;  %s145_s12 = sshll.u32 %s216_s2, 4  ;;  %s146_s12 = int_to_ptr.vmem [resolvable:$true] %s145_s12 }
   0x8   :  { %43 = vmatpush.msra.mxu0 %v17_v3  ;;  %168 = vmatpush.msra.mxu3 %v17_v3 }
   0x9   :  { %159 = vmatmul.msk.f32.vlgmr.msra.gmra.mxu0 %vm21_vm0, %v15_v4  ;;  %160 = vmatmul.msk.f32.vlgmr.msra.gmra.mxu3 %vm21_vm0, %v16_v5 }
   0xa   :  { %171 = vmatpush.msra.mxu2 %v106_v8  ;;  %126 = vmatpush.msra.mxu1 %v106_v8 }
   0xc   :  { %172 = vmatpush.msra.mxu2 %v105_v10  ;;  %127 = vmatpush.msra.mxu1 %v105_v10 }
   0xe   :  { %173 = vmatpush.msra.mxu2 %v104_v11  ;;  %128 = vmatpush.msra.mxu1 %v104_v11 }
  0x10   :  { %174 = vmatpush.msra.mxu2 %v103_v12  ;;  %129 = vmatpush.msra.mxu1 %v103_v12 }
  0x12   :  { %175 = vmatpush.msra.mxu2 %v102_v13  ;;  %130 = vmatpush.msra.mxu1 %v102_v13 }
  0x14   :  { %176 = vmatpush.msra.mxu2 %v101_v20  ;;  %131 = vmatpush.msra.mxu1 %v101_v20 }
  0x86   :  { %v45_v14 = vpop.f32.mrf.mxu0 }
  0x87   :  { %v161_v16 = vmul.f32 -1.442695, %v45_v14 }
  0x8c   :  { %v48_v9 = vpop.f32.mrf.mxu3 }
  0x8d   :  { %95 = vrot.lane.b32.xlu0 %v48_v9, %s215_s0  ;;  %v162_v15 = vmul.f32 -1.442695, %v48_v9 }
  0x8f   :  { %181 = vpow2.f32 %v162_v15 }
  0x90   :  { %183 = vpow2.f32 %v161_v16 }
  0x95   :  { %93 = vrot.lane.b32.xlu0 %v45_v14, %s215_s0  ;;  %v182_v17 = vpop.eup %181 }
  0x96   :  { %v58_v18 = vadd.f32 1.0, %v182_v17  ;;  %v184_v19 = vpop.eup %183 }
  0x97   :  { %v57_v21 = vadd.f32 1.0, %v184_v19 }
  0x98   :  { %185 = vrcp.f32 %v58_v18  ;;  %v85_v30 = vand.u32 2147483648, %v58_v18  ;;  %vm79_vm2 = vweird.f32 %v58_v18  ;;  %v83_v31 = vand.u32 2147483647, %v58_v18 }
  0x99   :  { %187 = vrcp.f32 %v57_v21  ;;  %vm64_vm4 = vweird.f32 %v57_v21  ;;  %v70_v35 = vand.u32 2147483648, %v57_v21  ;;  %v68_v38 = vand.u32 2147483647, %v57_v21 }
  0x9a   :  { %v86_v34 = vor.u32 1.1754944e-38, %v85_v30  ;;  %vm84_vm6 = vcmp.eq.f32.partialorder %v83_v31, 8.507059e+37 }
  0x9b   :  { %v71_v40 = vor.u32 1.1754944e-38, %v70_v35  ;;  %vm69_vm9 = vcmp.eq.f32.partialorder %v68_v38, 8.507059e+37 }
  0x9e   :  { %v186_v22 = vpop.eup %185 }
  0x9f   :  { %v75_v23 = vmul.f32 %v186_v22, %v58_v18  ;;  %v188_v25 = vpop.eup %187  ;;  %vm80_vm1 = vweird.f32 %v186_v22 }
  0xa0   :  { %v60_v26 = vmul.f32 %v188_v25, %v57_v21  ;;  %vm81_vm3 = vmor %vm79_vm2, %vm80_vm1  ;;  %vm65_vm5 = vweird.f32 %v188_v25 }
  0xa1   :  { %v76_v24 = vsub.f32 1.0, %v75_v23  ;;  %vm66_vm7 = vmor %vm64_vm4, %vm65_vm5 }
  0xa2   :  { %v61_v28 = vsub.f32 1.0, %v60_v26 }
  0xa3   :  { %v77_v27 = vmul.f32 %v186_v22, %v76_v24 }
  0xa4   :  { %v62_v32 = vmul.f32 %v188_v25, %v61_v28 }
  0xa5   :  { %v78_v29 = vadd.f32 %v186_v22, %v77_v27 }
  0xa6   :  { %v63_v37 = vadd.f32 %v188_v25, %v62_v32 }
  0xa7   :  { %v82_v33 = vsel %vm81_vm3, %v186_v22, %v78_v29 }
  0xa8   :  { %v87_v36 = vsel %vm84_vm6, %v86_v34, %v82_v33  ;;  %v67_v42 = vsel %vm66_vm7, %v188_v25, %v63_v37 }
  0xa9   :  { %v90_v39 = vmul.f32 %v87_v36, %v48_v9  ;;  %v72_v44 = vsel %vm69_vm9, %v71_v40, %v67_v42 }
  0xaa   :  { %v89_v45 = vmul.f32 %v72_v44, %v45_v14 }
  0xff   :  { %v96_v41 = vpop.permute.xlu0 %95 }
 0x100   :  { %v100_v43 = vmul.f32 %v96_v41, %v90_v39 }
 0x102   :  { %164 = vmatmul.msk.f32.vlgmr.msra.gmra.mxu2 %vm109_vm8, %v100_v43 }
 0x107   :  { %v94_v46 = vpop.permute.xlu0 %93 }
 0x108   :  { %v99_v47 = vmul.f32 %v94_v46, %v89_v45 }
 0x10a   :  { %163 = vmatmul.msk.f32.vlgmr.msra.gmra.mxu1 %vm109_vm8, %v99_v47 }
 0x185   :  { %v136_v48 = vpop.f32.mrf.mxu2 }
 0x186   :  { %140 = vst.msk [vmem:[#allocation2 + $0x8] sm:$0xff] %vm21_vm0, %v136_v48 }
 0x187   :  { %v133_v49 = vpop.f32.mrf.mxu1 }
 0x188   :  { %139 = vst.msk [vmem:[#allocation2] sm:$0xff] %vm21_vm0, %v133_v49 }
 0x189   :  { %153 = dma.vmem_to_hbm [thread:$0]  %s146_s12, 256, %s148_s15, [#allocation3], %s217_s16, %s217_s16, %s218_s17  }
 0x18a   :  { %213 = dma.done.wait [#allocation3], 256  }
 0x18b   :  { %214 = vsyncadd [#allocation3], 4294967040 }
 0x18c   :  { %158 = vsyncpa [#allocation3], 1 }

</bundles_post_ra>
